<compile_context>
chip_gen: v6e
topology: v6e:2x2x1
jax: 0.10.0
libtpu: 0.0.40
codegen_flags: <defaults>
</compile_context>

<pallas_src>
import functools

import jax
import jax.numpy as jnp
from jax.experimental import pallas as pl
from jax.experimental.pallas import tpu as pltpu

_LANES = 128      # rays per lane row (last dim must be 128-wide for dense vregs)
_EPS = 1e-15


def _make_ray_aabb_kernel(aabb_vals):
    """Build the slab-intersection kernel with AABB bounds baked as constants."""
    bmin = tuple(float(v) for v in aabb_vals[:3])
    bmax = tuple(float(v) for v in aabb_vals[3:])

    def kernel(rays_ref, near_ref, far_ref):
        # rays_ref : VMEM [6, tile_r, 128]  (ox, oy, oz, dx, dy, dz), dense tiles
        # near_ref : VMEM [tile_r, 128]
        # far_ref  : VMEM [tile_r, 128]
        eps = jnp.float32(_EPS)
        near = None
        far = None
        for i in range(3):                      # static unroll over x, y, z
            o = rays_ref[i].astype(jnp.float32)       # (tile_r, 128)
            d = rays_ref[i + 3].astype(jnp.float32)
            # sign-preserving epsilon: never flips direction of near-parallel rays
            safe_d = jnp.where(jnp.abs(d) < eps, jnp.where(d >= 0, eps, -eps), d)
            # exact reciprocal: kernel is HBM-bound, so the extra cycles are free
            inv_d = pl.reciprocal(safe_d, approx=False)
            t1 = (jnp.float32(bmin[i]) - o) * inv_d
            t2 = (jnp.float32(bmax[i]) - o) * inv_d
            tmin = jnp.minimum(t1, t2)
            tmax = jnp.maximum(t1, t2)
            near = tmin if near is None else jnp.maximum(near, tmin)
            far = tmax if far is None else jnp.minimum(far, tmax)

        # Convention (matches previous version): rays march forward (near >= 0),
        # misses are folded into far == near rather than flagged.
        near = jnp.maximum(near, jnp.float32(0.0))
        far = jnp.maximum(far, near)
        near_ref[...] = near
        far_ref[...] = far

    return kernel


def _pick_tile_r(r):
    """Largest power-of-two tile (<=1024 rows) dividing r with >=4 grid steps;
    else the largest divisor; else a single full-extent block (always legal)."""
    candidates = (1024, 512, 256, 128, 64, 32, 16, 8)
    for c in candidates:
        if r % c == 0 and r // c >= 4:
            return c
    for c in candidates:
        if r % c == 0:
            return c
    return r


@functools.partial(jax.jit, static_argnames=("aabb", "tile_r"))
def _ray_aabb_near_far_packed(rays_packed, *, aabb, tile_r):
    """rays_packed: [6, R, 128] f32 or bf16, component-major (ox,oy,oz,dx,dy,dz).

    Returns (near, far), each f32[R, 128] (ray index = row * 128 + lane).
    """
    six, r, lanes = rays_packed.shape
    assert six == 6 and lanes == _LANES, "expect [6, R, 128] component-major rays"
    assert r % tile_r == 0, "tile_r must divide the sublane-row count"

    grid_steps = r // tile_r
    itemsize = jnp.dtype(rays_packed.dtype).itemsize
    # double-buffered input tile + two double-buffered f32 output tiles, 2x margin
    step_bytes = 2 * (6 * tile_r * _LANES * itemsize + 2 * tile_r * _LANES * 4)
    vmem_limit = int(min(max(2 * step_bytes, 32 << 20), 64 << 20))

    kernel = _make_ray_aabb_kernel(aabb)
    near, far = pl.pallas_call(
        kernel,
        out_shape=(
            jax.ShapeDtypeStruct((r, _LANES), jnp.float32),
            jax.ShapeDtypeStruct((r, _LANES), jnp.float32),
        ),
        grid=(grid_steps,),
        in_specs=[pl.BlockSpec((6, tile_r, _LANES), lambda t: (0, t, 0))],
        out_specs=(
            pl.BlockSpec((tile_r, _LANES), lambda t: (t, 0)),
            pl.BlockSpec((tile_r, _LANES), lambda t: (t, 0)),
        ),
        compiler_params=pltpu.CompilerParams(
            dimension_semantics=("parallel",),   # shard ray tiles across TCs (v7x)
            vmem_limit_bytes=vmem_limit,
        ),
    )(rays_packed)
    return near, far


def ray_aabb_near_far_packed(aabb, rays_packed, *, tile_r=None):
    """Hot path.  rays_packed: [6, R, 128] (f32 or bf16), component-major."""
    if rays_packed.dtype not in (jnp.float32, jnp.bfloat16):
        rays_packed = jnp.asarray(rays_packed, jnp.float32)
    aabb_t = tuple(float(v) for v in jnp.asarray(aabb).reshape(-1))
    r = rays_packed.shape[1]
    if tile_r is None:
        tile_r = _pick_tile_r(r)
    return _ray_aabb_near_far_packed(rays_packed, aabb=aabb_t, tile_r=tile_r)


def ray_aabb_near_far(aabb, rays_o, rays_d, *, tile_r=None):
    """Compatibility (slow) path for PyTorch-style [N, 3] rays.

    NOTE: the AoS->SoA transpose below is an extra full HBM pass over the rays;
    prefer producing rays component-major upstream and calling
    ray_aabb_near_far_packed directly.
    """
    n = rays_o.shape[0]
    assert n % _LANES == 0, "pad ray count to a multiple of 128"
    r = n // _LANES
    packed = jnp.concatenate(
        [
            jnp.asarray(rays_o, jnp.float32).T.reshape(3, r, _LANES),
            jnp.asarray(rays_d, jnp.float32).T.reshape(3, r, _LANES),
        ],
        axis=0,
    )
    near, far = ray_aabb_near_far_packed(aabb, packed, tile_r=tile_r)
    return near.reshape(n), far.reshape(n)


class BaseRendererPallas:
    """JAX/Pallas port of NeMo's BaseRenderer."""

    def __init__(self, bound, update_interval):
        self.bound = float(bound)
        self.update_interval = update_interval
        # register_buffer('aabb', [-b, -b, -b, b, b, b]) — deterministic buffer.
        self.aabb = jnp.array(
            [-bound, -bound, -bound, bound, bound, bound], dtype=jnp.float32
        )
        # Static copy baked into the kernel closure (no scalar prefetch needed).
        self._aabb_static = (
            -self.bound, -self.bound, -self.bound,
            self.bound, self.bound, self.bound,
        )

    def update_step(self, epoch: int, global_step: int, decay: float = 0.95, **kwargs):
        # TODO(synk): abstract in the reference module; concrete renderers override.
        raise NotImplementedError

    def forward(self, rays_o, rays_d, return_normal_image=False,
                return_normal_perturb=False, **kwargs):
        # TODO(synk): reference forward() raises NotImplementedError; preserved.
        raise NotImplementedError

    # Pallas hot path shared by all concrete renderers.
    def near_far_from_aabb_packed(self, rays_packed, *, tile_r=None):
        return ray_aabb_near_far_packed(self._aabb_static, rays_packed, tile_r=tile_r)

    def near_far_from_aabb(self, rays_o, rays_d, *, tile_r=None):
        return ray_aabb_near_far(self._aabb_static, rays_o, rays_d, tile_r=tile_r)


def _ref_near_far(aabb, rays_o, rays_d):
    """Pure-JAX reference (slab method) on [N, 3] rays."""
    eps = jnp.float32(_EPS)
    d = jnp.where(jnp.abs(rays_d) < eps,
                  jnp.where(rays_d >= 0, eps, -eps), rays_d)
    inv_d = 1.0 / d
    t1 = (aabb[:3][None, :] - rays_o) * inv_d
    t2 = (aabb[3:][None, :] - rays_o) * inv_d
    near = jnp.maximum(jnp.minimum(t1, t2).max(-1), 0.0)
    far = jnp.maximum(t1, t2).min(-1)
    far = jnp.maximum(far, near)
    return near, far


if __name__ == "__main__":
    key = jax.random.PRNGKey(0)
    k_o, k_d = jax.random.split(key)

    renderer = BaseRendererPallas(bound=1.0, update_interval=16)

    # Small lane-aligned example: 256 sublane rows x 128 lanes = 32768 rays,
    # generated directly component-major ([6, R, 128]) — no wrapper transpose.
    R = 256
    origins = jax.random.uniform(k_o, (3, R, _LANES), jnp.float32, -0.5, 0.5)
    dirs = jax.random.normal(k_d, (3, R, _LANES), jnp.float32)
    dirs = dirs / jnp.linalg.norm(dirs, axis=0, keepdims=True)
    rays_packed = jnp.concatenate([origins, dirs], axis=0)   # (6, R, 128)

    near, far = renderer.near_far_from_aabb_packed(rays_packed)
    near = jax.block_until_ready(near)
    far = jax.block_until_ready(far)

    # Pure-JAX reference on the equivalent [N, 3] layout.
    n = R * _LANES
    rays_o = origins.reshape(3, n).T
    rays_d = dirs.reshape(3, n).T
    near_ref, far_ref = _ref_near_far(renderer.aabb, rays_o, rays_d)

    assert near.shape == (R, _LANES) and far.shape == (R, _LANES)
    assert bool(jnp.all(jnp.isfinite(near))) and bool(jnp.all(jnp.isfinite(far)))
    # origins are inside the AABB (and misses are clamped), so far >= near everywhere
    assert bool(jnp.all(far >= near))
    # exact reciprocal in-kernel -> tight tolerance
    assert bool(jnp.allclose(near.reshape(n), near_ref, rtol=1e-4, atol=1e-5))
    assert bool(jnp.allclose(far.reshape(n), far_ref, rtol=1e-4, atol=1e-5))

    # Sanity-check the [N, 3] compatibility (slow) path on a tiny batch.
    near_c, far_c = renderer.near_far_from_aabb(rays_o[: 8 * _LANES],
                                                rays_d[: 8 * _LANES])
    near_c = jax.block_until_ready(near_c)
    assert bool(jnp.allclose(near_c, near_ref[: 8 * _LANES], rtol=1e-4, atol=1e-5))
    assert bool(jnp.allclose(far_c, far_ref[: 8 * _LANES], rtol=1e-4, atol=1e-5))

    print("KERNEL_OK")
</pallas_src>

<mosaic_0001>
module attributes {stable_mosaic.version = 11 : i64} {
  func.func @kernel(%arg0: i32, %arg1: memref<6x64x128xf32, #tpu.memory_space<vmem>>, %arg2: memref<64x128xf32, #tpu.memory_space<vmem>>, %arg3: memref<64x128xf32, #tpu.memory_space<vmem>>) attributes {dimension_semantics = [#tpu.dimension_semantics<parallel>], iteration_bounds = array<i64: 4>, scalar_prefetch = 0 : i64, scratch_operands = 0 : i64, tpu.core_type = #tpu.core_type<tc>, window_params = [{transform_indices = @transform_0, window_bounds = array<i64: 6, 64, 128>}, {transform_indices = @transform_1, window_bounds = array<i64: 64, 128>}, {transform_indices = @transform_2, window_bounds = array<i64: 64, 128>}]} {
    %c0 = arith.constant 0 : index
    %c0_0 = arith.constant 0 : index
    %c0_1 = arith.constant 0 : index
    %0 = vector.load %arg1[%c0, %c0_0, %c0_1] : memref<6x64x128xf32, #tpu.memory_space<vmem>>, vector<1x64x128xf32>
    %1 = vector.shape_cast %0 : vector<1x64x128xf32> to vector<64x128xf32>
    %c3 = arith.constant 3 : index
    %c0_2 = arith.constant 0 : index
    %c0_3 = arith.constant 0 : index
    %2 = vector.load %arg1[%c3, %c0_2, %c0_3] : memref<6x64x128xf32, #tpu.memory_space<vmem>>, vector<1x64x128xf32>
    %3 = vector.shape_cast %2 : vector<1x64x128xf32> to vector<64x128xf32>
    %4 = math.absf %3 : vector<64x128xf32>
    %cst = arith.constant 1.000000e-15 : f32
    %5 = vector.broadcast %cst : f32 to vector<64x128xf32>
    %6 = arith.cmpf olt, %4, %5 : vector<64x128xf32>
    %cst_4 = arith.constant 0.000000e+00 : f32
    %7 = vector.broadcast %cst_4 : f32 to vector<64x128xf32>
    %8 = arith.cmpf oge, %3, %7 : vector<64x128xf32>
    %cst_5 = arith.constant 0.000000e+00 : f32
    %cst_6 = arith.constant 1.000000e-15 : f32
    %9 = arith.subf %cst_5, %cst_6 : f32
    %cst_7 = arith.constant 1.000000e-15 : f32
    %10 = vector.broadcast %cst_7 : f32 to vector<64x128xf32>
    %11 = vector.broadcast %9 : f32 to vector<64x128xf32>
    %12 = arith.select %8, %10, %11 : vector<64x128xi1>, vector<64x128xf32>
    %13 = arith.select %6, %12, %3 : vector<64x128xi1>, vector<64x128xf32>
    %14 = tpu.reciprocal %13 : vector<64x128xf32> -> vector<64x128xf32>
    %cst_8 = arith.constant -1.000000e+00 : f32
    %15 = vector.broadcast %cst_8 : f32 to vector<64x128xf32>
    %16 = arith.subf %15, %1 : vector<64x128xf32>
    %17 = arith.mulf %16, %14 : vector<64x128xf32>
    %cst_9 = arith.constant 1.000000e+00 : f32
    %18 = vector.broadcast %cst_9 : f32 to vector<64x128xf32>
    %19 = arith.subf %18, %1 : vector<64x128xf32>
    %20 = arith.mulf %19, %14 : vector<64x128xf32>
    %21 = arith.minimumf %17, %20 : vector<64x128xf32>
    %22 = arith.maximumf %17, %20 : vector<64x128xf32>
    %c1 = arith.constant 1 : index
    %c0_10 = arith.constant 0 : index
    %c0_11 = arith.constant 0 : index
    %23 = vector.load %arg1[%c1, %c0_10, %c0_11] : memref<6x64x128xf32, #tpu.memory_space<vmem>>, vector<1x64x128xf32>
    %24 = vector.shape_cast %23 : vector<1x64x128xf32> to vector<64x128xf32>
    %c4 = arith.constant 4 : index
    %c0_12 = arith.constant 0 : index
    %c0_13 = arith.constant 0 : index
    %25 = vector.load %arg1[%c4, %c0_12, %c0_13] : memref<6x64x128xf32, #tpu.memory_space<vmem>>, vector<1x64x128xf32>
    %26 = vector.shape_cast %25 : vector<1x64x128xf32> to vector<64x128xf32>
    %27 = math.absf %26 : vector<64x128xf32>
    %cst_14 = arith.constant 1.000000e-15 : f32
    %28 = vector.broadcast %cst_14 : f32 to vector<64x128xf32>
    %29 = arith.cmpf olt, %27, %28 : vector<64x128xf32>
    %cst_15 = arith.constant 0.000000e+00 : f32
    %30 = vector.broadcast %cst_15 : f32 to vector<64x128xf32>
    %31 = arith.cmpf oge, %26, %30 : vector<64x128xf32>
    %cst_16 = arith.constant 0.000000e+00 : f32
    %cst_17 = arith.constant 1.000000e-15 : f32
    %32 = arith.subf %cst_16, %cst_17 : f32
    %cst_18 = arith.constant 1.000000e-15 : f32
    %33 = vector.broadcast %cst_18 : f32 to vector<64x128xf32>
    %34 = vector.broadcast %32 : f32 to vector<64x128xf32>
    %35 = arith.select %31, %33, %34 : vector<64x128xi1>, vector<64x128xf32>
    %36 = arith.select %29, %35, %26 : vector<64x128xi1>, vector<64x128xf32>
    %37 = tpu.reciprocal %36 : vector<64x128xf32> -> vector<64x128xf32>
    %cst_19 = arith.constant -1.000000e+00 : f32
    %38 = vector.broadcast %cst_19 : f32 to vector<64x128xf32>
    %39 = arith.subf %38, %24 : vector<64x128xf32>
    %40 = arith.mulf %39, %37 : vector<64x128xf32>
    %cst_20 = arith.constant 1.000000e+00 : f32
    %41 = vector.broadcast %cst_20 : f32 to vector<64x128xf32>
    %42 = arith.subf %41, %24 : vector<64x128xf32>
    %43 = arith.mulf %42, %37 : vector<64x128xf32>
    %44 = arith.minimumf %40, %43 : vector<64x128xf32>
    %45 = arith.maximumf %40, %43 : vector<64x128xf32>
    %46 = arith.maximumf %21, %44 : vector<64x128xf32>
    %47 = arith.minimumf %22, %45 : vector<64x128xf32>
    %c2 = arith.constant 2 : index
    %c0_21 = arith.constant 0 : index
    %c0_22 = arith.constant 0 : index
    %48 = vector.load %arg1[%c2, %c0_21, %c0_22] : memref<6x64x128xf32, #tpu.memory_space<vmem>>, vector<1x64x128xf32>
    %49 = vector.shape_cast %48 : vector<1x64x128xf32> to vector<64x128xf32>
    %c5 = arith.constant 5 : index
    %c0_23 = arith.constant 0 : index
    %c0_24 = arith.constant 0 : index
    %50 = vector.load %arg1[%c5, %c0_23, %c0_24] : memref<6x64x128xf32, #tpu.memory_space<vmem>>, vector<1x64x128xf32>
    %51 = vector.shape_cast %50 : vector<1x64x128xf32> to vector<64x128xf32>
    %52 = math.absf %51 : vector<64x128xf32>
    %cst_25 = arith.constant 1.000000e-15 : f32
    %53 = vector.broadcast %cst_25 : f32 to vector<64x128xf32>
    %54 = arith.cmpf olt, %52, %53 : vector<64x128xf32>
    %cst_26 = arith.constant 0.000000e+00 : f32
    %55 = vector.broadcast %cst_26 : f32 to vector<64x128xf32>
    %56 = arith.cmpf oge, %51, %55 : vector<64x128xf32>
    %cst_27 = arith.constant 0.000000e+00 : f32
    %cst_28 = arith.constant 1.000000e-15 : f32
    %57 = arith.subf %cst_27, %cst_28 : f32
    %cst_29 = arith.constant 1.000000e-15 : f32
    %58 = vector.broadcast %cst_29 : f32 to vector<64x128xf32>
    %59 = vector.broadcast %57 : f32 to vector<64x128xf32>
    %60 = arith.select %56, %58, %59 : vector<64x128xi1>, vector<64x128xf32>
    %61 = arith.select %54, %60, %51 : vector<64x128xi1>, vector<64x128xf32>
    %62 = tpu.reciprocal %61 : vector<64x128xf32> -> vector<64x128xf32>
    %cst_30 = arith.constant -1.000000e+00 : f32
    %63 = vector.broadcast %cst_30 : f32 to vector<64x128xf32>
    %64 = arith.subf %63, %49 : vector<64x128xf32>
    %65 = arith.mulf %64, %62 : vector<64x128xf32>
    %cst_31 = arith.constant 1.000000e+00 : f32
    %66 = vector.broadcast %cst_31 : f32 to vector<64x128xf32>
    %67 = arith.subf %66, %49 : vector<64x128xf32>
    %68 = arith.mulf %67, %62 : vector<64x128xf32>
    %69 = arith.minimumf %65, %68 : vector<64x128xf32>
    %70 = arith.maximumf %65, %68 : vector<64x128xf32>
    %71 = arith.maximumf %46, %69 : vector<64x128xf32>
    %72 = arith.minimumf %47, %70 : vector<64x128xf32>
    %cst_32 = arith.constant 0.000000e+00 : f32
    %73 = vector.broadcast %cst_32 : f32 to vector<64x128xf32>
    %74 = arith.maximumf %71, %73 : vector<64x128xf32>
    %75 = arith.maximumf %72, %74 : vector<64x128xf32>
    %c0_33 = arith.constant 0 : index
    %c0_34 = arith.constant 0 : index
    %76 = vector.load %arg2[%c0_33, %c0_34] : memref<64x128xf32, #tpu.memory_space<vmem>>, vector<64x128xf32>
    tpu.vector_store %arg2[%c0_33, %c0_34], %74 {strides = array<i32>} : memref<64x128xf32, #tpu.memory_space<vmem>>, vector<64x128xf32>,
    %c0_35 = arith.constant 0 : index
    %c0_36 = arith.constant 0 : index
    %77 = vector.load %arg3[%c0_35, %c0_36] : memref<64x128xf32, #tpu.memory_space<vmem>>, vector<64x128xf32>
    tpu.vector_store %arg3[%c0_35, %c0_36], %75 {strides = array<i32>} : memref<64x128xf32, #tpu.memory_space<vmem>>, vector<64x128xf32>,
    return
  }
  func.func @transform_0(%arg0: i32) -> (i32, i32, i32) {
    %c0_i32 = arith.constant 0 : i32
    %c0_i32_0 = arith.constant 0 : i32
    %c0_i32_1 = arith.constant 0 : i32
    return %c0_i32, %arg0, %c0_i32_0 : i32, i32, i32
  }
  func.func @transform_1(%arg0: i32) -> (i32, i32) {
    %c0_i32 = arith.constant 0 : i32
    %c0_i32_0 = arith.constant 0 : i32
    return %arg0, %c0_i32 : i32, i32
  }
  func.func @transform_2(%arg0: i32) -> (i32, i32) {
    %c0_i32 = arith.constant 0 : i32
    %c0_i32_0 = arith.constant 0 : i32
    return %arg0, %c0_i32 : i32, i32
  }
}

</mosaic_0001>

<bundles_post_ra>
// kernel: _ray_aabb_near_far_packed.1
= control target key start
LH: loop header
LB: loop body
LE: loop exit
PB: predicated region body
PF: predicated region fallthrough
CT: control target
= control target key end

     0   :  { %8 = vsyncpa [#allocation3], 0  ;;  %s1723_s0 = inlined_call_operand.hbm [shape: f32[6,256,128], index: 0, kind: input, shape index: {}]   ;;  %s1724_s1 = inlined_call_operand.hbm [shape: f32[256,128], index: 1, kind: output, shape index: {0}]   ;;  %s1725_s2 = inlined_call_operand.hbm [shape: f32[256,128], index: 2, kind: output, shape index: {1}]  }
   0x1   :  { %10 = vsyncpa [#allocation3 + $0x1], 0 }
   0x2   :  { %11 = vsyncpa [#allocation4], 0 }
   0x3   :  { %13 = vsyncpa [#allocation4 + $0x1], 0 }
   0x4   :  { %14 = vsyncpa [#allocation7], 0 }
   0x5   :  { %16 = vsyncpa [#allocation7 + $0x1], 0  ;;  %s1039_s9 = smov 0   ;;  %s1041_s10 = smov 0  }
   0x6   :  { %s1043_s11 = smov 0   ;;  %s1045_s12 = smov 0  }
   0x7 LB: > { %s1060_s13 = sadd.s32 4294967295, %s1012_s12   ;;  %s746_s14 = sadd.s32 4294967294, %s1012_s12   ;;  %s1012_s12 = sphi %s1045_s12, %s1760_s12   ;;  %s1008_s11 = sphi %s1043_s11, %s1759_s11   ;;  %s1004_s10 = sphi %s1041_s10, %s1758_s10   ;;  %s1000_s9 = sphi %s1039_s9, %s1757_s9  }
   0x8   : > { %s1064_s15 = sadd.s32 1, %s1012_s12   ;;  %s29_s16 = sadd.s32 1, %s1008_s11 }
   0x9   : > { %s26_s17 = ssub.s32 %s1012_s12, %s1064_s15  ;;  %p36_p0 = scmp.ne.s32.totalorder %s1008_s11, %s1004_s10 }
   0xa   : > { %p27_p1 = scmp.eq.s32.totalorder %s26_s17, 0  ;;  %p37_p2 = scmp.eq.s32.totalorder %s1012_s12, 0 }
   0xb   : > { %p42_p3 = scmp.ne.s32.totalorder %s1004_s10, %s1000_s9  ;;  %p43_p4 = scmp.eq.s32.totalorder %s1060_s13, 0 }
   0xc   : > { %s1076_s18 = scalar_select %p27_p1, %s1008_s11, %s29_s16  }
   0xd   : > { %p1078_p5 = por %p37_p2, %p36_p0  ;;  %p1082_p6 = por %p43_p4, %p42_p3 }
   0xe   : > { %p66_p7 = scmp.eq.s32.totalorder %s1060_s13, 3  ;;  %p72_p8 = scmp.eq.s32.totalorder %s746_s14, 3 }
   0xf   : > { %p748_p11 = scmp.ge.s32.totalorder %s1012_s12, 4 }
  0x10   : > { %p1087_p9 = por %p66_p7, %p36_p0  ;;  %p1091_p10 = por %p72_p8, %p42_p3 }
  0x11   : > { %114 = sbr.rel (%p748_p11) target bundleno = 36 (0x24), region = 16 }
  0x16   : > { %s118_s23 = sand.u32 1, %s1008_s11   ;;  %s804_s25 = sshll.u32 %s1012_s12, 10 }
  0x17   : > { %s807_s24 = smul.u32 384, %s118_s23  ;;  %s1014_s26 = smov 4096  }
  0x18   : > { %810 = sst [smem:[#allocation9]] (%p1078_p5), %s1014_s26  ;;  %s1015_s3 = smov 1024  }
  0x19   : > { %s809_s27 = scalar_select %p1078_p5, [#allocation0], [#allocation10] }
  0x1a   : > { %s122_s29 = scalar_lea.vmem [#allocation2], %s807_s24  ;;  %811 = sst [smem:[#allocation9 + $0x1]] (%p1078_p5), %s1015_s3 }
  0x1b   : > { %s133_s28 = sld [smem:[%s809_s27]]   ;;  %s141_s30 = sshll.u32 %s122_s29, 4  ;;  %s142_s30 = int_to_ptr.vmem [resolvable:$true] %s141_s30 }
  0x1c   : > { %s1016_s4 = smov 8   ;;  %s128_s7 = scalar_lea.hbm %s1723_s0, %s804_s25 }
  0x1d   : > { %812 = sst [smem:[#allocation9 + $0x2]] (%p1078_p5), %s1016_s4  ;;  %s1017_s8 = smov 128  }
  0x1e   : > { %813 = sst [smem:[#allocation9 + $0x3]] (%p1078_p5), %s1017_s8  ;;  %s119_s17 = scalar_lea.sflag [#allocation3], %s118_s23 }
  0x1f   : > { %814 = sst [smem:[#allocation9 + $0x4]] (%p1078_p5), %s1017_s8  ;;  %s1018_s24 = smov 131072  }
  0x20   : > { %815 = sst [smem:[#allocation9 + $0x5]] (%p1078_p5), %s1016_s4 }
  0x21   : > { %s751_s14 = sshll.u32 %s133_s28, 26 }
  0x22   : > { %s752_s16 = sadd.s32 134217728, %s751_s14 }
  0x23   : > { %816 = dma.general (%p1078_p5), %s128_s7, 6144, %s142_s30, %s119_s17, %s1018_s24, [#allocation9], %s752_s16, 0  }
  0x24 PF: > { %p753_p12 = scmp.ge.s32.totalorder %s1012_s12, 1  ;;  %p162_p13 = scmp.lt.s32.totalorder %s1012_s12, 5 }
  0x26   : > { %p163_p0 = pnand %p753_p12, %p162_p13 }
  0x27   : > { %s1120_s25 = sand.u32 (!%p163_p0), 1, %s1004_s10  }
  0x28   : > { %166 = sbr.rel (%p163_p0) target bundleno = 175 (0xaf), region = 24  ;;  %s169_s27 = scalar_lea.sflag (!%p163_p0), [#allocation3], %s1120_s25 }
  0x29   : > { %s808_s26 = smul.u32 (!%p163_p0), 384, %s1120_s25 }
  0x2b   : > { %s1124_s28 = scalar_lea.vmem (!%p163_p0), [#allocation2], %s808_s26 }
  0x2d   : > { %987 = dma.done.wait (%p1082_p6), %s169_s27, 6144  }
  0x2e   : > { %989 = vsyncadd (%p1082_p6), %s169_s27, 4294961152  ;;  %v1131_v0 = vld [vmem:[%s1124_s28] sm:$0xff]  ;;  %v1019_v7 = vmov -1e-15   ;;  %v1151_v18 = vld [vmem:[%s1124_s28 + $0x8] sm:$0xff]  ;;  %s754_s19 = sshll.u32 %s1120_s25, 6 }
  0x2f   : > { %v756_v1 = vld [vmem:[%s1124_s28 + $0xc0] sm:$0xff]  ;;  %v266_v4 = vsub.f32 -1.0, %v1131_v0  ;;  %v282_v5 = vsub.f32 1.0, %v1131_v0  ;;  %v757_v21 = vld [vmem:[%s1124_s28 + $0xc8] sm:$0xff]  ;;  %v267_v28 = vsub.f32 -1.0, %v1151_v18  ;;  %v283_v29 = vsub.f32 1.0, %v1151_v18 }
  0x30   : > { %v1135_v2 = vld [vmem:[%s1124_s28 + $0x40] sm:$0xff]  ;;  %v218_v3 = vand.u32 2147483647, %v756_v1  ;;  %vm234_vm0 = vcmp.ge.f32.partialorder %v756_v1, 0.0  ;;  %v1155_v22 = vld [vmem:[%s1124_s28 + $0x48] sm:$0xff]  ;;  %vm235_vm5 = vcmp.ge.f32.partialorder %v757_v21, 0.0 }
  0x31   : > { %v772_v6 = vld [vmem:[%s1124_s28 + $0x100] sm:$0xff]  ;;  %v242_v8 = vsel %vm234_vm0, 1e-15, %v1019_v7  ;;  %v380_v10 = vsub.f32 -1.0, %v1135_v2  ;;  %v396_v12 = vsub.f32 1.0, %v1135_v2  ;;  %v773_v23 = vld [vmem:[%s1124_s28 + $0x108] sm:$0xff] }
  0x32   : > { %v332_v9 = vand.u32 2147483647, %v772_v6  ;;  %vm348_vm1 = vcmp.ge.f32.partialorder %v772_v6, 0.0  ;;  %vm226_vm2 = vcmp.lt.f32.partialorder %v218_v3, 1e-15  ;;  %v1145_v13 = vld [vmem:[%s1124_s28 + $0x80] sm:$0xff] }
  0x33   : > { %v356_v11 = vsel %vm348_vm1, 1e-15, %v1019_v7  ;;  %v250_v14 = vsel %vm226_vm2, %v242_v8, %v756_v1  ;;  %v788_v15 = vld [vmem:[%s1124_s28 + $0x140] sm:$0xff]  ;;  %v510_v16 = vsub.f32 -1.0, %v1145_v13  ;;  %v526_v17 = vsub.f32 1.0, %v1145_v13  ;;  %v1160_v26 = vld [vmem:[%s1124_s28 + $0x88] sm:$0xff] }
  0x34   : > { %vm340_vm3 = vcmp.lt.f32.partialorder %v332_v9, 1e-15  ;;  %870 = vrcp.f32 %v250_v14  ;;  %v462_v20 = vand.u32 2147483647, %v788_v15  ;;  %vm478_vm4 = vcmp.ge.f32.partialorder %v788_v15, 0.0  ;;  %v789_v32 = vld [vmem:[%s1124_s28 + $0x148] sm:$0xff] }
  0x35   : > { %v364_v19 = vsel %vm340_vm3, %v356_v11, %v772_v6  ;;  %v486_v24 = vsel %vm478_vm4, 1e-15, %v1019_v7  ;;  %v219_v25 = vand.u32 2147483647, %v757_v21  ;;  %v243_v27 = vsel %vm235_vm5, 1e-15, %v1019_v7 }
  0x36   : > { %872 = vrcp.f32 %v364_v19  ;;  %vm470_vm6 = vcmp.lt.f32.partialorder %v462_v20, 1e-15  ;;  %v333_v31 = vand.u32 2147483647, %v773_v23  ;;  %vm349_vm8 = vcmp.ge.f32.partialorder %v773_v23, 0.0  ;;  %v758_v36 = vld [vmem:[%s1124_s28 + $0xd0] sm:$0xff] }
  0x37   : > { %v494_v30 = vsel %vm470_vm6, %v486_v24, %v788_v15  ;;  %vm227_vm7 = vcmp.lt.f32.partialorder %v219_v25, 1e-15  ;;  %v357_v34 = vsel %vm349_vm8, 1e-15, %v1019_v7  ;;  %v381_v35 = vsub.f32 -1.0, %v1155_v22  ;;  %v1171_v39 = vld [vmem:[%s1124_s28 + $0x10] sm:$0xff] }
  0x38   : > { %874 = vrcp.f32 %v494_v30  ;;  %v251_v33 = vsel %vm227_vm7, %v243_v27, %v757_v21  ;;  %vm341_vm9 = vcmp.lt.f32.partialorder %v333_v31, 1e-15  ;;  %v397_v37 = vsub.f32 1.0, %v1155_v22  ;;  %v1176_v43 = vld [vmem:[%s1124_s28 + $0x50] sm:$0xff]  ;;  %v759_v57 = vld [vmem:[%s1124_s28 + $0xd8] sm:$0xff]  ;;  %s1297_s20 = scalar_lea.vmem [#allocation5], %s754_s19 }
  0x39   : > { %876 = vrcp.f32 %v251_v33  ;;  %v463_v38 = vand.u32 2147483647, %v789_v32  ;;  %v365_v40 = vsel %vm341_vm9, %v357_v34, %v773_v23  ;;  %vm479_vm10 = vcmp.ge.f32.partialorder %v789_v32, 0.0  ;;  %v774_v44 = vld [vmem:[%s1124_s28 + $0x110] sm:$0xff]  ;;  %v1194_v63 = vld [vmem:[%s1124_s28 + $0x18] sm:$0xff]  ;;  %s1597_s23 = scalar_lea.vmem [#allocation6], %s754_s19 }
  0x3a   : > { %v511_v41 = vsub.f32 -1.0, %v1160_v26  ;;  %v527_v42 = vsub.f32 1.0, %v1160_v26  ;;  %878 = vrcp.f32 %v365_v40  ;;  %v487_v45 = vsel %vm479_vm10, 1e-15, %v1019_v7  ;;  %v1183_v50 = vld [vmem:[%s1124_s28 + $0x90] sm:$0xff]  ;;  %v775_v15 = vld [vmem:[%s1124_s28 + $0x118] sm:$0xff] }
  0x3b   : > { %vm471_vm11 = vcmp.lt.f32.partialorder %v463_v38, 1e-15  ;;  %v220_v46 = vand.u32 2147483647, %v758_v36  ;;  %vm236_vm12 = vcmp.ge.f32.partialorder %v758_v36, 0.0  ;;  %v268_v48 = vsub.f32 -1.0, %v1171_v39 }
  0x3c   : > { %v495_v47 = vsel %vm471_vm11, %v487_v45, %v789_v32  ;;  %v284_v49 = vsub.f32 1.0, %v1171_v39  ;;  %v790_v51 = vld [vmem:[%s1124_s28 + $0x150] sm:$0xff]  ;;  %v244_v52 = vsel %vm236_vm12, 1e-15, %v1019_v7  ;;  %v334_v53 = vand.u32 2147483647, %v774_v44 }
  0x3d   : > { %880 = vrcp.f32 %v495_v47  ;;  %vm228_vm13 = vcmp.lt.f32.partialorder %v220_v46, 1e-15  ;;  %vm350_vm14 = vcmp.ge.f32.partialorder %v774_v44, 0.0  ;;  %v382_v55 = vsub.f32 -1.0, %v1176_v43  ;;  %v760_v45 = vld [vmem:[%s1124_s28 + $0xe0] sm:$0xff]  ;;  %s625_s29 = sshll.u32 %s1297_s20, 4  ;;  %s1639_s29 = int_to_ptr.vmem [resolvable:$true] %s625_s29 }
  0x3e   : > { %v252_v54 = vsel %vm228_vm13, %v244_v52, %v758_v36  ;;  %v398_v56 = vsub.f32 1.0, %v1176_v43  ;;  %vm342_vm15 = vcmp.lt.f32.partialorder %v334_v53, 1e-15  ;;  %v358_v58 = vsel %vm350_vm14, 1e-15, %v1019_v7  ;;  %v791_v36 = vld [vmem:[%s1124_s28 + $0x158] sm:$0xff] }
  0x3f   : > { %882 = vrcp.f32 %v252_v54  ;;  %v464_v59 = vand.u32 2147483647, %v790_v51  ;;  %v366_v60 = vsel %vm342_vm15, %v358_v58, %v774_v44  ;;  %vm480_vm0 = vcmp.ge.f32.partialorder %v790_v51, 0.0  ;;  %v1276_v54 = vld [vmem:[%s1124_s28 + $0x20] sm:$0xff]  ;;  %s805_s30 = sshll.u32 %s1060_s13, 10  ;;  %s641_s3 = sshll.u32 %s1597_s23, 4  ;;  %s1647_s3 = int_to_ptr.vmem [resolvable:$true] %s641_s3 }
  0x40   : > { %v512_v61 = vsub.f32 -1.0, %v1183_v50  ;;  %v528_v62 = vsub.f32 1.0, %v1183_v50  ;;  %884 = vrcp.f32 %v366_v60  ;;  %v488_v3 = vsel %vm480_vm0, 1e-15, %v1019_v7  ;;  %s1645_s6 = scalar_lea.hbm %s1724_s1, %s805_s30  ;;  %s1653_s8 = scalar_lea.hbm %s1725_s2, %s805_s30 }
  0x41   : > { %v871_v1 = vpop.eup %870  ;;  %vm472_vm1 = vcmp.lt.f32.partialorder %v464_v59, 1e-15  ;;  %v221_v6 = vand.u32 2147483647, %v759_v57  ;;  %vm237_vm2 = vcmp.ge.f32.partialorder %v759_v57, 0.0  ;;  %v285_v21 = vsub.f32 1.0, %v1194_v63 }
  0x42   : > { %v1199_v9 = vmul.f32 %v871_v1, %v266_v4  ;;  %v1203_v11 = vmul.f32 %v871_v1, %v282_v5  ;;  %v496_v14 = vsel %vm472_vm1, %v488_v3, %v790_v51  ;;  %v245_v0 = vsel %vm237_vm2, 1e-15, %v1019_v7  ;;  %v1368_v59 = vld [vmem:[%s1124_s28 + $0x28] sm:$0xff]  ;;  %s607_s14 = scalar_lea.sflag [#allocation4], %s1120_s25  ;;  %s918_s16 = scalar_lea.vmem %s1639_s29, 1024 }
  0x43   : > { %v873_v8 = vpop.eup %872  ;;  %886 = vrcp.f32 %v496_v14  ;;  %vm229_vm3 = vcmp.lt.f32.partialorder %v221_v6, 1e-15  ;;  %v269_v5 = vsub.f32 -1.0, %v1194_v63  ;;  %v335_v24 = vand.u32 2147483647, %v775_v15  ;;  %v776_v6 = vld [vmem:[%s1124_s28 + $0x120] sm:$0xff]  ;;  %p919_p1 = scmp.ne.s32.totalorder %s1639_s29, %s918_s16 }
  0x44   : > { %v1208_v19 = vmul.f32 %v873_v8, %v380_v10  ;;  %v1212_v20 = vmul.f32 %v873_v8, %v396_v12  ;;  %v298_v4 = vmin.f32 %v1199_v9, %v1203_v11  ;;  %v253_v2 = vsel %vm229_vm3, %v245_v0, %v759_v57  ;;  %v1222_v12 = vld [vmem:[%s1124_s28 + $0x58] sm:$0xff]  ;;  %s1020_s17 = smov [#allocation5]  }
  0x45   : > { %v875_v23 = vpop.eup %874  ;;  %vm351_vm4 = vcmp.ge.f32.partialorder %v775_v15, 0.0  ;;  %888 = vrcp.f32 %v253_v2  ;;  %vm343_vm5 = vcmp.lt.f32.partialorder %v335_v24, 1e-15  ;;  %v383_v40 = vsub.f32 -1.0, %v1222_v12  ;;  %p920_p2 = pnand %p919_p1, %p1087_p9  ;;  %s922_s24 = sshll.u32 %s1020_s17, 4  ;;  %s923_s24 = int_to_ptr.vmem [resolvable:$false] %s922_s24 }
  0x46   : > { %v412_v10 = vmin.f32 %v1208_v19, %v1212_v20  ;;  %v877_v25 = vpop.eup %876  ;;  %v1226_v27 = vmul.f32 %v875_v23, %v510_v16  ;;  %v1230_v30 = vmul.f32 %v875_v23, %v526_v17  ;;  %v359_v31 = vsel %vm351_vm4, 1e-15, %v1019_v7  ;;  %v1242_v16 = vld [vmem:[%s1124_s28 + $0x98] sm:$0xff]  ;;  %v1322_v23 = vld [vmem:[%s1124_s28 + $0x60] sm:$0xff]  ;;  %s924_s26 = scalar_lea.vmem %s923_s24, 2048  ;;  %p925_p4 = scmp.lt.s32.totalorder %s1639_s29, %s923_s24 }
  0x47   : > { %v1235_v33 = vmul.f32 %v877_v25, %v267_v28  ;;  %v1239_v34 = vmul.f32 %v877_v25, %v283_v29  ;;  %v879_v13 = vpop.eup %878  ;;  %v367_v38 = vsel %vm343_vm5, %v359_v31, %v775_v15  ;;  %v399_v28 = vsub.f32 1.0, %v1222_v12  ;;  %v1386_v15 = vld [vmem:[%s1124_s28 + $0x68] sm:$0xff]  ;;  %p921_p3 = pneg %p920_p2  ;;  %p926_p5 = scmp.lt.s32.totalorder %s924_s26, %s918_s16 }
  0x48   : > { %v428_v32 = vmax.f32 %v298_v4, %v412_v10  ;;  %v542_v17 = vmin.f32 %v1226_v27, %v1230_v30  ;;  %v1254_v29 = vmul.f32 %v879_v13, %v381_v35  ;;  %v1258_v44 = vmul.f32 %v879_v13, %v397_v37 }
  0x49   : > { %v299_v18 = vmin.f32 %v1235_v33, %v1239_v34  ;;  %890 = vrcp.f32 %v367_v38  ;;  %v465_v51 = vand.u32 2147483647, %v791_v36  ;;  %vm481_vm6 = vcmp.ge.f32.partialorder %v791_v36, 0.0  ;;  %p927_p6 = por %p926_p5, %p925_p4 }
  0x4a   : > { %v881_v46 = vpop.eup %880  ;;  %v1261_v47 = vmax.f32 %v428_v32, %v542_v17  ;;  %v513_v52 = vsub.f32 -1.0, %v1242_v16  ;;  %v413_v53 = vmin.f32 %v1254_v29, %v1258_v44  ;;  %v489_v37 = vsel %vm481_vm6, 1e-15, %v1019_v7  ;;  %v792_v17 = vld [vmem:[%s1124_s28 + $0x160] sm:$0xff] }
  0x4b   : > { %v1268_v35 = vmul.f32 %v881_v46, %v511_v41  ;;  %v1272_v22 = vmul.f32 %v881_v46, %v527_v42  ;;  %vm1279_vm7 = vcmp.lt.f32.partialorder %v465_v51, 1e-15  ;;  %v529_v60 = vsub.f32 1.0, %v1242_v16  ;;  %p928_p7 = pnand %p927_p6, %p921_p3 }
  0x4c   : > { %v883_v57 = vpop.eup %882  ;;  %v1728_v58 = vmax.f32 %v1261_v47, 0.0  ;;  %v222_v1 = vand.u32 2147483647, %v760_v45  ;;  %v429_v41 = vmax.f32 %v299_v18, %v413_v53  ;;  %v497_v14 = vsel %vm1279_vm7, %v489_v37, %v791_v36  ;;  %v1352_v18 = vld [vmem:[%s1124_s28 + $0xa0] sm:$0xff] }
  0x4d   : > { %v543_v26 = vmin.f32 %v1268_v35, %v1272_v22  ;;  %v1288_v42 = vmul.f32 %v883_v57, %v268_v48  ;;  %v1292_v3 = vmul.f32 %v883_v57, %v284_v49  ;;  %v885_v8 = vpop.eup %884  ;;  %vm238_vm9 = vcmp.ge.f32.partialorder %v760_v45, 0.0 }
  0x4e   : > { %590 = vst [vmem:[%s1297_s20] sm:$0xff] %v1728_v58  ;;  %vm1304_vm8 = vcmp.lt.f32.partialorder %v222_v1, 1e-15  ;;  %v270_v39 = vsub.f32 -1.0, %v1276_v54  ;;  %v1315_v4 = vmul.f32 %v885_v8, %v382_v55  ;;  %v1319_v0 = vmul.f32 %v885_v8, %v398_v56 }
  0x4f   : > { %v1309_v48 = vmax.f32 %v429_v41, %v543_v26  ;;  %v300_v49 = vmin.f32 %v1288_v42, %v1292_v3  ;;  %892 = vrcp.f32 %v497_v14  ;;  %v246_v2 = vsel %vm238_vm9, 1e-15, %v1019_v7 }
  0x50   : > { %v887_v10 = vpop.eup %886  ;;  %v286_v24 = vsub.f32 1.0, %v1276_v54  ;;  %v336_v25 = vand.u32 2147483647, %v776_v6  ;;  %v414_v55 = vmin.f32 %v1315_v4, %v1319_v0  ;;  %v254_v32 = vsel %vm1304_vm8, %v246_v2, %v760_v45 }
  0x51   : > { %v1727_v31 = vmax.f32 %v1309_v48, 0.0  ;;  %v1331_v43 = vmul.f32 %v887_v10, %v512_v61  ;;  %v1335_v56 = vmul.f32 %v887_v10, %v528_v62  ;;  %vm352_vm11 = vcmp.ge.f32.partialorder %v776_v6, 0.0 }
  0x52   : > { %vm1339_vm10 = vcmp.lt.f32.partialorder %v336_v25, 1e-15  ;;  %v384_v13 = vsub.f32 -1.0, %v1322_v23  ;;  %v889_v38 = vpop.eup %888  ;;  %v430_v50 = vmax.f32 %v300_v49, %v414_v55  ;;  %894 = vrcp.f32 %v254_v32  ;;  %v777_v49 = vld [vmem:[%s1124_s28 + $0x128] sm:$0xff] }
  0x53   : > { %591 = vst [vmem:[%s1297_s20 + $0x8] sm:$0xff] %v1727_v31  ;;  %v544_v61 = vmin.f32 %v1331_v43, %v1335_v56  ;;  %v360_v62 = vsel %vm352_vm11, 1e-15, %v1019_v7  ;;  %v1356_v45 = vmul.f32 %v889_v38, %v269_v5  ;;  %v1360_v46 = vmul.f32 %v889_v38, %v285_v21  ;;  %v761_v5 = vld [vmem:[%s1124_s28 + $0xe8] sm:$0xff] }
  0x54   : > { %v368_v51 = vsel %vm1339_vm10, %v360_v62, %v776_v6  ;;  %v400_v53 = vsub.f32 1.0, %v1322_v23  ;;  %v466_v57 = vand.u32 2147483647, %v792_v17  ;;  %vm482_vm12 = vcmp.ge.f32.partialorder %v792_v17, 0.0  ;;  %v1398_v55 = vld [vmem:[%s1124_s28 + $0xa8] sm:$0xff]  ;;  %v1459_v23 = vld [vmem:[%s1124_s28 + $0x38] sm:$0xff] }
  0x55   : > { %v1365_v37 = vmax.f32 %v430_v50, %v544_v61  ;;  %896 = vrcp.f32 %v368_v51  ;;  %v301_v63 = vmin.f32 %v1356_v45, %v1360_v46  ;;  %v490_v21 = vsel %vm482_vm12, 1e-15, %v1019_v7  ;;  %v793_v32 = vld [vmem:[%s1124_s28 + $0x168] sm:$0xff]  ;;  %v1405_v51 = vld [vmem:[%s1124_s28 + $0x30] sm:$0xff] }
  0x56   : > { %v891_v1 = vpop.eup %890  ;;  %v514_v41 = vsub.f32 -1.0, %v1352_v18  ;;  %v530_v26 = vsub.f32 1.0, %v1352_v18  ;;  %vm474_vm13 = vcmp.lt.f32.partialorder %v466_v57, 1e-15  ;;  %v223_v2 = vand.u32 2147483647, %v761_v5 }
  0x57   : > { %v1726_v6 = vmax.f32 %v1365_v37, 0.0  ;;  %v1379_v8 = vmul.f32 %v891_v1, %v383_v40  ;;  %v1383_v14 = vmul.f32 %v891_v1, %v399_v28  ;;  %v498_v10 = vsel %vm474_vm13, %v490_v21, %v792_v17  ;;  %v762_v1 = vld [vmem:[%s1124_s28 + $0xf0] sm:$0xff] }
  0x58   : > { %vm239_vm14 = vcmp.ge.f32.partialorder %v761_v5, 0.0  ;;  %v271_v25 = vsub.f32 -1.0, %v1368_v59  ;;  %898 = vrcp.f32 %v498_v10  ;;  %v287_v28 = vsub.f32 1.0, %v1368_v59 }
  0x59   : > { %592 = vst [vmem:[%s1297_s20 + $0x10] sm:$0xff] %v1726_v6  ;;  %v415_v40 = vmin.f32 %v1379_v8, %v1383_v14  ;;  %v247_v12 = vsel %vm239_vm14, 1e-15, %v1019_v7  ;;  %vm231_vm15 = vcmp.lt.f32.partialorder %v223_v2, 1e-15  ;;  %vm353_vm0 = vcmp.ge.f32.partialorder %v777_v49, 0.0 }
  0x5a   : > { %v337_v36 = vand.u32 2147483647, %v777_v49  ;;  %v385_v17 = vsub.f32 -1.0, %v1386_v15  ;;  %v255_v50 = vsel %vm231_vm15, %v247_v12, %v761_v5  ;;  %v361_v61 = vsel %vm353_vm0, 1e-15, %v1019_v7 }
  0x5b   : > { %v431_v38 = vmax.f32 %v301_v63, %v415_v40  ;;  %v401_v62 = vsub.f32 1.0, %v1386_v15  ;;  %900 = vrcp.f32 %v255_v50  ;;  %v467_v57 = vand.u32 2147483647, %v793_v32  ;;  %v1479_v63 = vld [vmem:[%s1124_s28 + $0x78] sm:$0xff] }
  0x5c   : > { %vm345_vm1 = vcmp.lt.f32.partialorder %v337_v36, 1e-15  ;;  %vm483_vm2 = vcmp.ge.f32.partialorder %v793_v32, 0.0  ;;  %v893_v21 = vpop.eup %892  ;;  %v778_v36 = vld [vmem:[%s1124_s28 + $0x130] sm:$0xff]  ;;  %v224_v6 = vand.u32 2147483647, %v762_v1 }
  0x5d   : > { %v369_v10 = vsel %vm345_vm1, %v361_v61, %v777_v49  ;;  %v491_v2 = vsel %vm483_vm2, 1e-15, %v1019_v7  ;;  %v1413_v40 = vmul.f32 %v893_v21, %v513_v52  ;;  %v1417_v12 = vmul.f32 %v893_v21, %v529_v60  ;;  %v1422_v61 = vld [vmem:[%s1124_s28 + $0x70] sm:$0xff]  ;;  %v779_v49 = vld [vmem:[%s1124_s28 + $0x138] sm:$0xff] }
  0x5e   : > { %902 = vrcp.f32 %v369_v10  ;;  %vm475_vm3 = vcmp.lt.f32.partialorder %v467_v57, 1e-15  ;;  %vm240_vm4 = vcmp.ge.f32.partialorder %v762_v1, 0.0  ;;  %vm232_vm5 = vcmp.lt.f32.partialorder %v224_v6, 1e-15  ;;  %v794_v60 = vld [vmem:[%s1124_s28 + $0x170] sm:$0xff] }
  0x5f   : > { %v499_v50 = vsel %vm475_vm3, %v491_v2, %v793_v32  ;;  %v895_v31 = vpop.eup %894  ;;  %v545_v52 = vmin.f32 %v1413_v40, %v1417_v12  ;;  %v248_v16 = vsel %vm240_vm4, 1e-15, %v1019_v7  ;;  %v338_v21 = vand.u32 2147483647, %v778_v36 }
  0x60   : > { %904 = vrcp.f32 %v499_v50  ;;  %v1430_v32 = vmul.f32 %v895_v31, %v270_v39  ;;  %v1434_v57 = vmul.f32 %v895_v31, %v286_v24  ;;  %v256_v58 = vsel %vm232_vm5, %v248_v16, %v762_v1  ;;  %v1451_v31 = vld [vmem:[%s1124_s28 + $0xb0] sm:$0xff] }
  0x61   : > { %v1436_v2 = vmax.f32 %v431_v38, %v545_v52  ;;  %vm354_vm6 = vcmp.ge.f32.partialorder %v778_v36, 0.0  ;;  %906 = vrcp.f32 %v256_v58  ;;  %vm346_vm7 = vcmp.lt.f32.partialorder %v338_v21, 1e-15 }
  0x62   : > { %v897_v10 = vpop.eup %896  ;;  %v302_v39 = vmin.f32 %v1430_v32, %v1434_v57  ;;  %v362_v38 = vsel %vm354_vm6, 1e-15, %v1019_v7  ;;  %v468_v16 = vand.u32 2147483647, %v794_v60  ;;  %vm484_vm8 = vcmp.ge.f32.partialorder %v794_v60, 0.0 }
  0x63   : > { %v1444_v54 = vmul.f32 %v897_v10, %v384_v13  ;;  %v1448_v24 = vmul.f32 %v897_v10, %v400_v53  ;;  %v1729_v6 = vmax.f32 %v1436_v2, 0.0  ;;  %v370_v13 = vsel %vm346_vm7, %v362_v38, %v778_v36  ;;  %v763_v53 = vld [vmem:[%s1124_s28 + $0xf8] sm:$0xff] }
  0x64   : > { %908 = vrcp.f32 %v370_v13  ;;  %v492_v21 = vsel %vm484_vm8, 1e-15, %v1019_v7  ;;  %vm476_vm9 = vcmp.lt.f32.partialorder %v468_v16, 1e-15  ;;  %vm241_vm10 = vcmp.ge.f32.partialorder %v763_v53, 0.0 }
  0x65   : > { %v416_v52 = vmin.f32 %v1444_v54, %v1448_v24  ;;  %v899_v58 = vpop.eup %898  ;;  %593 = vst [vmem:[%s1297_s20 + $0x18] sm:$0xff] %v1729_v6  ;;  %v500_v5 = vsel %vm476_vm9, %v492_v21, %v794_v60  ;;  %v225_v6 = vand.u32 2147483647, %v763_v53  ;;  %vm355_vm12 = vcmp.ge.f32.partialorder %v779_v49, 0.0 }
  0x66   : > { %v1470_v36 = vmul.f32 %v899_v58, %v514_v41  ;;  %v1474_v38 = vmul.f32 %v899_v58, %v530_v26  ;;  %910 = vrcp.f32 %v500_v5  ;;  %v249_v41 = vsel %vm241_vm10, 1e-15, %v1019_v7 }
  0x67   : > { %v432_v50 = vmax.f32 %v302_v39, %v416_v52  ;;  %vm233_vm11 = vcmp.lt.f32.partialorder %v225_v6, 1e-15  ;;  %v339_v52 = vand.u32 2147483647, %v779_v49 }
  0x68   : > { %v901_v10 = vpop.eup %900  ;;  %v546_v39 = vmin.f32 %v1470_v36, %v1474_v38  ;;  %v257_v5 = vsel %vm233_vm11, %v249_v41, %v763_v53  ;;  %v1740_v41 = vsub.f32 -1.0, %v1398_v55 }
  0x69   : > { %v1487_v26 = vmul.f32 %v901_v10, %v271_v25  ;;  %v1491_v60 = vmul.f32 %v901_v10, %v287_v28  ;;  %912 = vrcp.f32 %v257_v5  ;;  %v1507_v28 = vld [vmem:[%s1124_s28 + $0xb8] sm:$0xff]  ;;  %vm347_vm13 = vcmp.lt.f32.partialorder %v339_v52, 1e-15 }
  0x6a   : > { %v1493_v58 = vmax.f32 %v432_v50, %v546_v39  ;;  %v795_v50 = vld [vmem:[%s1124_s28 + $0x178] sm:$0xff]  ;;  %v363_v10 = vsel %vm355_vm12, 1e-15, %v1019_v7  ;;  %v517_v39 = vsub.f32 -1.0, %v1507_v28 }
  0x6b   : > { %v903_v16 = vpop.eup %902  ;;  %v303_v18 = vmin.f32 %v1487_v26, %v1491_v60  ;;  %v371_v5 = vsel %vm347_vm13, %v363_v10, %v779_v49  ;;  %v469_v52 = vand.u32 2147483647, %v795_v50  ;;  %vm485_vm14 = vcmp.ge.f32.partialorder %v795_v50, 0.0 }
  0x6c   : > { %v1500_v25 = vmul.f32 %v903_v16, %v385_v17  ;;  %v1504_v59 = vmul.f32 %v903_v16, %v401_v62  ;;  %v578_v53 = vmax.f32 %v1493_v58, 0.0  ;;  %v1741_v62 = vsub.f32 1.0, %v1398_v55 }
  0x6d   : > { %v905_v6 = vpop.eup %904  ;;  %914 = vrcp.f32 %v371_v5  ;;  %v1743_v10 = vsub.f32 1.0, %v1405_v51  ;;  %vm477_vm15 = vcmp.lt.f32.partialorder %v469_v52, 1e-15  ;;  %v306_v5 = vmax.f32 %v1199_v9, %v1203_v11 }
  0x6e   : > { %v417_v17 = vmin.f32 %v1500_v25, %v1504_v59  ;;  %v1517_v15 = vmul.f32 %v905_v6, %v1740_v41  ;;  %v1521_v16 = vmul.f32 %v905_v6, %v1741_v62  ;;  %594 = vst [vmem:[%s1297_s20 + $0x20] sm:$0xff] %v578_v53  ;;  %v907_v21 = vpop.eup %906  ;;  %v493_v41 = vsel %vm485_vm14, 1e-15, %v1019_v7 }
  0x6f   : > { %v1742_v6 = vsub.f32 -1.0, %v1405_v51  ;;  %v1537_v62 = vmul.f32 %v907_v21, %v1743_v10  ;;  %v420_v7 = vmax.f32 %v1208_v19, %v1212_v20  ;;  %v550_v55 = vmax.f32 %v1226_v27, %v1230_v30 }
  0x70   : > { %v433_v13 = vmax.f32 %v303_v18, %v417_v17  ;;  %v547_v1 = vmin.f32 %v1517_v15, %v1521_v16  ;;  %v501_v17 = vsel %vm477_vm15, %v493_v41, %v795_v50  ;;  %v421_v9 = vmax.f32 %v1254_v29, %v1258_v44 }
  0x71   : > { %v1533_v49 = vmul.f32 %v907_v21, %v1742_v6  ;;  %v909_v6 = vpop.eup %908  ;;  %916 = vrcp.f32 %v501_v17  ;;  %v307_v21 = vmax.f32 %v1235_v33, %v1239_v34  ;;  %v1745_v20 = vsub.f32 1.0, %v1422_v61 }
  0x72   : > { %v1541_v18 = vmax.f32 %v433_v13, %v547_v1  ;;  %v1744_v1 = vsub.f32 -1.0, %v1422_v61  ;;  %v436_v30 = vmin.f32 %v306_v5, %v420_v7  ;;  %v551_v50 = vmax.f32 %v1268_v35, %v1272_v22 }
  0x73   : > { %v304_v51 = vmin.f32 %v1533_v49, %v1537_v62  ;;  %v1560_v27 = vmul.f32 %v909_v6, %v1745_v20  ;;  %v437_v13 = vmin.f32 %v307_v21, %v421_v9  ;;  %v308_v33 = vmax.f32 %v1288_v42, %v1292_v3  ;;  %v911_v29 = vpop.eup %910 }
  0x74   : > { %v579_v11 = vmax.f32 %v1541_v18, 0.0  ;;  %v1556_v19 = vmul.f32 %v909_v6, %v1744_v1  ;;  %v422_v34 = vmax.f32 %v1315_v4, %v1319_v0  ;;  %v566_v61 = vmin.f32 %v436_v30, %v550_v55 }
  0x75   : > { %v552_v52 = vmax.f32 %v1331_v43, %v1335_v56  ;;  %v309_v35 = vmax.f32 %v1356_v45, %v1360_v46  ;;  %v1746_v22 = vsub.f32 -1.0, %v1451_v31  ;;  %v1747_v3 = vsub.f32 1.0, %v1451_v31 }
  0x76   : > { %595 = vst [vmem:[%s1297_s20 + $0x28] sm:$0xff] %v579_v11  ;;  %v418_v44 = vmin.f32 %v1556_v19, %v1560_v27  ;;  %v567_v0 = vmin.f32 %v437_v13, %v551_v50  ;;  %v438_v41 = vmin.f32 %v308_v33, %v422_v34  ;;  %v1748_v5 = vmax.f32 %v1261_v47, 0.0  ;;  %v913_v56 = vpop.eup %912 }
  0x77   : > { %v524_v42 = vmul.f32 %v911_v29, %v1746_v22  ;;  %v540_v4 = vmul.f32 %v911_v29, %v1747_v3  ;;  %v423_v55 = vmax.f32 %v1379_v8, %v1383_v14  ;;  %v553_v43 = vmax.f32 %v1413_v40, %v1417_v12 }
  0x78   : > { %v434_v10 = vmax.f32 %v304_v51, %v418_v44  ;;  %v582_v17 = vmax.f32 %v566_v61, %v1748_v5  ;;  %v1749_v46 = vmax.f32 %v1309_v48, 0.0  ;;  %v568_v6 = vmin.f32 %v438_v41, %v552_v52 }
  0x79   : > { %v548_v45 = vmin.f32 %v524_v42, %v540_v4  ;;  %v310_v31 = vmax.f32 %v1430_v32, %v1434_v57  ;;  %v1750_v51 = vsub.f32 -1.0, %v1459_v23  ;;  %v1751_v47 = vsub.f32 1.0, %v1459_v23 }
  0x7a   : > { %v583_v7 = vmax.f32 %v567_v0, %v1749_v46  ;;  %598 = vst [vmem:[%s1597_s23] sm:$0xff] %v582_v17  ;;  %v439_v8 = vmin.f32 %v309_v35, %v423_v55  ;;  %v424_v48 = vmax.f32 %v1444_v54, %v1448_v24  ;;  %v1752_v40 = vmax.f32 %v1365_v37, 0.0  ;;  %v915_v23 = vpop.eup %914 }
  0x7b   : > { %v281_v21 = vmul.f32 %v913_v56, %v1750_v51  ;;  %v297_v9 = vmul.f32 %v913_v56, %v1751_v47  ;;  %v564_v14 = vmax.f32 %v434_v10, %v548_v45  ;;  %v554_v32 = vmax.f32 %v1470_v36, %v1474_v38 }
  0x7c   : > { %599 = vst [vmem:[%s1597_s23 + $0x8] sm:$0xff] %v583_v7  ;;  %v584_v12 = vmax.f32 %v568_v6, %v1752_v40  ;;  %v311_v57 = vmax.f32 %v1487_v26, %v1491_v60  ;;  %v569_v20 = vmin.f32 %v439_v8, %v553_v43  ;;  %v440_v30 = vmin.f32 %v310_v31, %v424_v48 }
  0x7d   : > { %v305_v1 = vmin.f32 %v281_v21, %v297_v9  ;;  %v425_v13 = vmax.f32 %v1500_v25, %v1504_v59  ;;  %v580_v54 = vmax.f32 %v564_v14, 0.0  ;;  %v1753_v24 = vsub.f32 -1.0, %v1479_v63 }
  0x7e   : > { %v1754_v50 = vsub.f32 1.0, %v1479_v63  ;;  %600 = vst [vmem:[%s1597_s23 + $0x10] sm:$0xff] %v584_v12  ;;  %v555_v36 = vmax.f32 %v1517_v15, %v1521_v16  ;;  %v1755_v38 = vmax.f32 %v1436_v2, 0.0  ;;  %v570_v60 = vmin.f32 %v440_v30, %v554_v32  ;;  %v917_v61 = vpop.eup %916 }
  0x7f   : > { %v395_v37 = vmul.f32 %v915_v23, %v1753_v24  ;;  %v441_v34 = vmin.f32 %v311_v57, %v425_v13  ;;  %v312_v25 = vmax.f32 %v1533_v49, %v1537_v62  ;;  %596 = vst [vmem:[%s1297_s20 + $0x30] sm:$0xff] %v580_v54  ;;  %v426_v63 = vmax.f32 %v1556_v19, %v1560_v27 }
  0x80   : > { %v411_v33 = vmul.f32 %v915_v23, %v1754_v50  ;;  %v585_v26 = vmax.f32 %v569_v20, %v1755_v38  ;;  %v556_v29 = vmax.f32 %v524_v42, %v540_v4  ;;  %v313_v44 = vmax.f32 %v281_v21, %v297_v9 }
  0x81   : > { %v586_v2 = vmax.f32 %v570_v60, %v578_v53  ;;  %v571_v15 = vmin.f32 %v441_v34, %v555_v36  ;;  %v525_v49 = vmul.f32 %v917_v61, %v517_v39  ;;  %v1756_v62 = vsub.f32 1.0, %v1507_v28 }
  0x82   : > { %v419_v59 = vmin.f32 %v395_v37, %v411_v33  ;;  %601 = vst [vmem:[%s1597_s23 + $0x18] sm:$0xff] %v585_v26  ;;  %v427_v16 = vmax.f32 %v395_v37, %v411_v33  ;;  %v442_v19 = vmin.f32 %v312_v25, %v426_v63 }
  0x83   : > { %v541_v35 = vmul.f32 %v917_v61, %v1756_v62  ;;  %602 = vst [vmem:[%s1597_s23 + $0x20] sm:$0xff] %v586_v2  ;;  %v587_v27 = vmax.f32 %v571_v15, %v579_v11 }
  0x84   : > { %v435_v52 = vmax.f32 %v305_v1, %v419_v59  ;;  %v443_v22 = vmin.f32 %v313_v44, %v427_v16  ;;  %v572_v53 = vmin.f32 %v442_v19, %v556_v29 }
  0x85   : > { %v549_v58 = vmin.f32 %v525_v49, %v541_v35  ;;  %v557_v42 = vmax.f32 %v525_v49, %v541_v35  ;;  %603 = vst [vmem:[%s1597_s23 + $0x28] sm:$0xff] %v587_v27 }
  0x86   : > { %v588_v28 = vmax.f32 %v572_v53, %v580_v54 }
  0x87   : > { %v565_v39 = vmax.f32 %v435_v52, %v549_v58  ;;  %v573_v3 = vmin.f32 %v443_v22, %v557_v42 }
  0x88   : > { %604 = vst [vmem:[%s1597_s23 + $0x30] sm:$0xff] %v588_v28 }
  0x89   : > { %v581_v18 = vmax.f32 %v565_v39, 0.0 }
  0x8b   : > { %597 = vst [vmem:[%s1297_s20 + $0x38] sm:$0xff] %v581_v18  ;;  %v589_v11 = vmax.f32 %v573_v3, %v581_v18 }
  0x8c   : > { %931 = shalt.err (!%p928_p7)
}
  0x8d   : > { %s932_s27 = scalar_lea.hbm %s1645_s6, 1024  ;;  %s936_s20 = scalar_lea.hbm %s1724_s1, 4096 }
  0x8e   : > { %p933_p8 = scmp.ne.s32.totalorder %s1645_s6, %s932_s27  ;;  %p937_p13 = scmp.lt.s32.totalorder %s1645_s6, %s1724_s1 }
  0x8f   : > { %p938_p0 = scmp.lt.s32.totalorder %s936_s20, %s932_s27 }
  0x90   : > { %p934_p11 = pnand %p933_p8, %p1087_p9 }
  0x91   : > { %p939_p1 = por %p938_p0, %p937_p13 }
  0x92   : > { %p935_p12 = pneg %p934_p11 }
  0x94   : > { %p940_p2 = pnand %p939_p1, %p935_p12 }
  0x96   : > { %943 = shalt.err (!%p940_p2)
}
  0x97   : > { %s1021_s5 = smov 128   ;;  %s1022_s13 = smov 8   ;;  %605 = vst [vmem:[%s1597_s23 + $0x38] sm:$0xff] %v589_v11 }
  0x98   : > { %818 = dma.vmem_to_hbm [thread:$0]  (%p1087_p9), %s1639_s29, 1024, %s1645_s6, %s607_s14, %s1021_s5, %s1021_s5, %s1022_s13  }
  0x99   : > { %s612_s7 = scalar_lea.sflag [#allocation7], %s1120_s25  ;;  %s944_s16 = scalar_lea.vmem %s1647_s3, 1024 }
  0x9a   : > { %p945_p3 = scmp.ne.s32.totalorder %s1647_s3, %s944_s16  ;;  %s1023_s17 = smov [#allocation6]  }
  0x9b   : > { %s948_s24 = sshll.u32 %s1023_s17, 4  ;;  %s949_s24 = int_to_ptr.vmem [resolvable:$false] %s948_s24 }
  0x9c   : > { %p946_p4 = pnand %p945_p3, %p1087_p9  ;;  %s950_s26 = scalar_lea.vmem %s949_s24, 2048 }
  0x9d   : > { %p951_p6 = scmp.lt.s32.totalorder %s1647_s3, %s949_s24  ;;  %p952_p7 = scmp.lt.s32.totalorder %s950_s26, %s944_s16 }
  0x9e   : > { %p947_p5 = pneg %p946_p4 }
  0x9f   : > { %p953_p8 = por %p952_p7, %p951_p6 }
  0xa1   : > { %p954_p11 = pnand %p953_p8, %p947_p5 }
  0xa3   : > { %957 = shalt.err (!%p954_p11)
}
  0xa4   : > { %s958_s23 = scalar_lea.hbm %s1653_s8, 1024  ;;  %s962_s6 = scalar_lea.hbm %s1725_s2, 4096 }
  0xa5   : > { %p959_p12 = scmp.ne.s32.totalorder %s1653_s8, %s958_s23  ;;  %p963_p1 = scmp.lt.s32.totalorder %s1653_s8, %s1725_s2 }
  0xa6   : > { %p964_p2 = scmp.lt.s32.totalorder %s962_s6, %s958_s23 }
  0xa7   : > { %p960_p13 = pnand %p959_p12, %p1087_p9 }
  0xa8   : > { %p965_p3 = por %p964_p2, %p963_p1 }
  0xa9   : > { %p961_p0 = pneg %p960_p13 }
  0xab   : > { %p966_p4 = pnand %p965_p3, %p961_p0 }
  0xad   : > { %969 = shalt.err (!%p966_p4)
}
  0xae   : > { %819 = dma.vmem_to_hbm [thread:$0]  (%p1087_p9), %s1647_s3, 1024, %s1653_s8, %s612_s7, %s1021_s5, %s1021_s5, %s1022_s13  }
  0xaf PF: > { %p829_p5 = scmp.ge.s32.totalorder %s1012_s12, 2  ;;  %s656_s28 = sand.u32 1, %s1000_s9  }
  0xb0   : > { %s657_s19 = scalar_lea.sflag [#allocation4], %s656_s28 }
  0xb1   : > { %p823_p6 = pnand %p829_p5, %p1091_p10 }
  0xb3   : > { %p824_p7 = pneg %p823_p6 }
  0xb5   : > { %991 = dma.done.wait (%p824_p7), %s657_s19, 1024  }
  0xb6   : > { %993 = vsyncadd (%p824_p7), %s657_s19, 4294966272  ;;  %s666_s20 = scalar_lea.sflag [#allocation7], %s656_s28 }
  0xb7   : > { %995 = dma.done.wait (%p824_p7), %s666_s20, 1024  }
  0xb8   : > { %997 = vsyncadd (%p824_p7), %s666_s20, 4294966272  ;;  %p19_p9 = scmp.ge.s32.totalorder %s1064_s15, 6   ;;  %s1757_s9 = smov %s1004_s10 }
  0xb9   : > { %s1758_s10 = smov %s1008_s11  ;;  %s1759_s11 = smov %s1076_s18 }
  0xba   : > { %s1760_s12 = smov %s1064_s15  ;;  %21 = sbr.rel (!%p19_p9) target bundleno = 7 (0x7), region = 96 }
  0xbf   :  { %671 = vsyncpa [#allocation3], 1 }
  0xc0   :  { %673 = vsyncpa [#allocation3 + $0x1], 1 }
  0xc1   :  { %674 = vsyncpa [#allocation4], 1 }
  0xc2   :  { %676 = vsyncpa [#allocation4 + $0x1], 1 }
  0xc3   :  { %677 = vsyncpa [#allocation7], 1 }
  0xc4   :  { %679 = vsyncpa [#allocation7 + $0x1], 1 }

</bundles_post_ra>
